<compile_context>
chip_gen: v5e
topology: v5e:2x2
jax: 0.10.0
libtpu: 0.0.40
codegen_flags: <defaults>
</compile_context>

<pallas_src>
import jax
import jax.numpy as jnp
from jax.experimental import pallas as pl
from jax.experimental.pallas import tpu as pltpu

_LANE = 128
_MAX_LANES = 32 * 1024  # fold up to 32768 elements into the lane dimension


def _round_up(a: int, b: int) -> int:
    return ((a + b - 1) // b) * b


def _identity_kernel(x_ref, o_ref):
    # Pure pass-through: load the tile and store it unchanged.
    o_ref[...] = x_ref[...]


def identity_quan(x: jax.Array, *, target_block_bytes: int = 4 << 20) -> jax.Array:
    """IdentityQuan.forward(x) -> x, computed via a Pallas copy kernel.

    Shape and dtype are preserved exactly for any input.
    NOTE: for a true identity in production, simply `return x` (or donate the
    input and use input_output_aliases) — nothing beats skipping the copy.
    """
    orig_shape = x.shape
    dtype = x.dtype
    n = x.size
    if n == 0:
        return x

    itemsize = jnp.dtype(dtype).itemsize
    # Sublane packing: 8 rows/vreg for 32-bit, 16 for bf16, 32 for int8/fp8.
    sublane = max(8, 32 // max(1, itemsize))

    # Lane-dense layout: as wide as possible (multiple of 128), up to 32768.
    cols = min(_MAX_LANES, _round_up(n, _LANE))
    rows = pl.cdiv(n, cols)
    padded_n = rows * cols  # padding is always < cols elements

    flat = x.reshape(-1)
    if padded_n != n:
        flat = jnp.pad(flat, (0, padded_n - n))
    x2d = flat.reshape(rows, cols)

    # Row tile: ~target_block_bytes per block, multiple of the sublane pack.
    row_bytes = cols * itemsize
    tr = max(sublane, ((target_block_bytes // row_bytes) // sublane) * sublane)
    if tr >= rows:
        tr = rows  # single full-extent block (always a legal block shape)
    grid = (pl.cdiv(rows, tr),)

    block_bytes = tr * row_bytes
    # in + out, each double-buffered, plus headroom; stay under v7x's 64 MiB.
    vmem_limit = int(min(48 << 20, max(16 << 20, 4 * block_bytes + (4 << 20))))

    out2d = pl.pallas_call(
        _identity_kernel,
        out_shape=jax.ShapeDtypeStruct((rows, cols), dtype),
        grid_spec=pltpu.PrefetchScalarGridSpec(
            num_scalar_prefetch=0,
            grid=grid,
            in_specs=[pl.BlockSpec((tr, cols), lambda i: (i, 0))],
            out_specs=pl.BlockSpec((tr, cols), lambda i: (i, 0)),
        ),
        compiler_params=pltpu.CompilerParams(
            dimension_semantics=("parallel",),
            vmem_limit_bytes=vmem_limit,
        ),
        cost_estimate=pl.CostEstimate(
            flops=0,
            transcendentals=0,
            bytes_accessed=2 * padded_n * itemsize,
        ),
    )(x2d)

    out_flat = out2d.reshape(-1)
    if padded_n != n:
        out_flat = out_flat[:n]
    return out_flat.reshape(orig_shape)


if __name__ == "__main__":
    key = jax.random.PRNGKey(0)

    # Primary test: small NCHW activation (conv-quantizer use case).
    x = jax.random.normal(key, (2, 4, 16, 16), dtype=jnp.float32)
    y = identity_quan(x)
    jax.block_until_ready(y)
    assert y.shape == x.shape and y.dtype == x.dtype
    assert bool(jnp.all(y == x))

    # Multi-block / pipelined path (small target block forces a >1 grid).
    k1, k2, k3 = jax.random.split(key, 3)
    x2 = jax.random.normal(k1, (2, 4, 256, 256), dtype=jnp.float32)
    y2 = identity_quan(x2, target_block_bytes=512 << 10)
    jax.block_until_ready(y2)
    assert y2.shape == x2.shape and y2.dtype == x2.dtype
    assert bool(jnp.all(y2 == x2))

    # Non-128-divisible element count (pad + slice path).
    x3 = jax.random.normal(k2, (3, 5, 7), dtype=jnp.float32)
    y3 = identity_quan(x3)
    jax.block_until_ready(y3)
    assert y3.shape == x3.shape and y3.dtype == x3.dtype
    assert bool(jnp.all(y3 == x3))

    # Sub-32-bit dtype (bf16 sublane packing path).
    x4 = jax.random.normal(k3, (4, 16, 16), dtype=jnp.float32).astype(jnp.bfloat16)
    y4 = identity_quan(x4)
    jax.block_until_ready(y4)
    assert y4.shape == x4.shape and y4.dtype == x4.dtype
    assert bool(jnp.all(y4 == x4))

    print("KERNEL_OK")
</pallas_src>

<mosaic_0001>
module attributes {stable_mosaic.version = 11 : i64} {
  func.func @_identity_kernel(%arg0: i32, %arg1: memref<1x2048xf32, #tpu.memory_space<vmem>>, %arg2: memref<1x2048xf32, #tpu.memory_space<vmem>>) attributes {dimension_semantics = [#tpu.dimension_semantics<parallel>], iteration_bounds = array<i64: 1>, scalar_prefetch = 0 : i64, scratch_operands = 0 : i64, tpu.core_type = #tpu.core_type<tc>, window_params = [{transform_indices = @transform_0, window_bounds = array<i64: 1, 2048>}, {transform_indices = @transform_1, window_bounds = array<i64: 1, 2048>}]} {
    %c0 = arith.constant 0 : index
    %c0_0 = arith.constant 0 : index
    %0 = vector.load %arg1[%c0, %c0_0] : memref<1x2048xf32, #tpu.memory_space<vmem>>, vector<1x2048xf32>
    %c0_1 = arith.constant 0 : index
    %c0_2 = arith.constant 0 : index
    %1 = vector.load %arg2[%c0_1, %c0_2] : memref<1x2048xf32, #tpu.memory_space<vmem>>, vector<1x2048xf32>
    tpu.vector_store %arg2[%c0_1, %c0_2], %0 {strides = array<i32>} : memref<1x2048xf32, #tpu.memory_space<vmem>>, vector<1x2048xf32>,
    return
  }
  func.func @transform_0(%arg0: i32) -> (i32, i32) {
    %c0_i32 = arith.constant 0 : i32
    %c0_i32_0 = arith.constant 0 : i32
    return %arg0, %c0_i32 : i32, i32
  }
  func.func @transform_1(%arg0: i32) -> (i32, i32) {
    %c0_i32 = arith.constant 0 : i32
    %c0_i32_0 = arith.constant 0 : i32
    return %arg0, %c0_i32 : i32, i32
  }
}

</mosaic_0001>

<bundles_post_ra>
// kernel: tpu_custom_call.1
= control target key start
LH: loop header
LB: loop body
LE: loop exit
PB: predicated region body
PF: predicated region fallthrough
CT: control target
= control target key end

     0   :  { %6 = vsyncpa [#allocation3], 0  ;;  %s116_s0 = inlined_call_operand.hbm [shape: f32[1,2048], index: 0, kind: input, shape index: {}]   ;;  %s117_s1 = inlined_call_operand.hbm [shape: f32[1,2048], index: 1, kind: output, shape index: {}]  }
   0x1   :  { %7 = vsyncpa [#allocation4], 0  ;;  %s13_s8 = sshll.u32 %s116_s0, 4  ;;  %s98_s9 = smov [#allocation2]   ;;  %s14_s8 = int_to_ptr.hbm [resolvable:$true] %s13_s8 }
   0x2   :  { %s15_s10 = sshll.u32 %s98_s9, 4  ;;  %s16_s10 = int_to_ptr.vmem [resolvable:$true] %s15_s10 }
   0x3   :  { %18 = dma.hbm_to_vmem [thread:$0]  %s14_s8, 256, %s16_s10, [#allocation3]  }
   0x4   :  { %94 = dma.done.wait [#allocation3], 256  }
   0x5   :  { %95 = vsyncadd [#allocation3], 4294967040  ;;  %s99_s11 = smov [#allocation5]   ;;  %s34_s15 = sshll.u32 %s117_s1, 4  ;;  %v23_v0 = vld [vmem:[#allocation2] sm:$0xff]  ;;  %v24_v1 = vld [vmem:[#allocation2 + $0x8] sm:$0xff]  ;;  %s35_s15 = int_to_ptr.hbm [resolvable:$true] %s34_s15 }
   0x6   :  { %s32_s12 = sshll.u32 %s99_s11, 4  ;;  %25 = vst [vmem:[#allocation5] sm:$0xff] %v23_v0  ;;  %s33_s12 = int_to_ptr.vmem [resolvable:$true] %s32_s12 }
   0x7   :  { %26 = vst [vmem:[#allocation5 + $0x8] sm:$0xff] %v24_v1 }
   0x8   :  { %37 = dma.vmem_to_hbm [thread:$0]  %s33_s12, 256, %s35_s15, [#allocation4]  }
   0x9   :  { %96 = dma.done.wait [#allocation4], 256  }
   0xa   :  { %97 = vsyncadd [#allocation4], 4294967040 }
   0xb   :  { %42 = vsyncpa [#allocation3], 1 }
   0xc   :  { %43 = vsyncpa [#allocation4], 1 }

</bundles_post_ra>
